<compile_context>
chip_gen: v7x
topology: tpu7x:2x2x1
jax: 0.10.0
libtpu: 0.0.40
codegen_flags: <defaults>
</compile_context>

<pallas_src>
import numpy as np
import jax
import jax.numpy as jnp
from jax.experimental import pallas as pl
from jax.experimental.pallas import tpu as pltpu

_LANES = 128


def ss_lin_kernel(w_ref, x0_ref, x1_ref, u_ref, dx0_ref, dx1_ref):
    # w_ref: (6,) f32 in SMEM = [a00, a01, a10, a11, b0, b1]
    a00 = w_ref[0]
    a01 = w_ref[1]
    a10 = w_ref[2]
    a11 = w_ref[3]
    b0 = w_ref[4]
    b1 = w_ref[5]

    x0 = x0_ref[...]
    x1 = x1_ref[...]
    u = u_ref[...]

    # Pure VPU broadcast FMAs (memory-bound op; MXU would be pure latency).
    dx0_ref[...] = a00 * x0 + a01 * x1 + b0 * u
    dx1_ref[...] = a10 * x0 + a11 * x1 + b1 * u


def state_space_model_lin(X, U, A, B, *, block_rows=2048):
    """X: (N, 2), U: (N, 1), A: (2, 2), B: (2, 1) -> dx: (N, 2), all f32."""
    X = jnp.asarray(X, jnp.float32)
    U = jnp.asarray(U, jnp.float32)
    N = X.shape[0]

    # nn.Linear computes x @ W^T, so:
    #   dx0 = A[0,0]*x0 + A[0,1]*x1 + B[0,0]*u
    #   dx1 = A[1,0]*x0 + A[1,1]*x1 + B[1,0]*u
    A = jnp.asarray(A, jnp.float32).reshape(2, 2)
    B = jnp.asarray(B, jnp.float32).reshape(2, 1)
    w = jnp.concatenate([A.reshape(-1), B.reshape(-1)])  # (6,) -> SMEM scalars

    # Lane-dense SoA layout: (rows, 128) planes; rows multiple of 8 and of
    # block_rows.  Zero padding; padded output rows are sliced away.
    rows = pl.cdiv(N, _LANES)
    rows = ((rows + 7) // 8) * 8
    block_rows = max(8, (min(block_rows, rows) // 8) * 8)
    rows = pl.cdiv(rows, block_rows) * block_rows
    n_pad = rows * _LANES

    def plane(col):  # (N,) -> (rows, 128), zero padded, wrapper owns the layout
        return jnp.pad(col, (0, n_pad - N)).reshape(rows, _LANES)

    x0 = plane(X[:, 0])
    x1 = plane(X[:, 1])
    u = plane(U[:, 0])

    blk = pl.BlockSpec((block_rows, _LANES), lambda i, w_sref: (i, 0))
    plane_shape = jax.ShapeDtypeStruct((rows, _LANES), jnp.float32)

    dx0, dx1 = pl.pallas_call(
        ss_lin_kernel,
        out_shape=(plane_shape, plane_shape),
        grid_spec=pltpu.PrefetchScalarGridSpec(
            num_scalar_prefetch=1,            # weights -> SMEM
            grid=(rows // block_rows,),
            in_specs=[blk, blk, blk],
            out_specs=[blk, blk],
        ),
        compiler_params=pltpu.CompilerParams(
            dimension_semantics=("parallel",)),  # v7x: shard across both TCs
    )(w, x0, x1, u)

    # Back to the module's (N, 2) AoS layout.
    return jnp.stack([dx0.reshape(-1)[:N], dx1.reshape(-1)[:N]], axis=-1)


if __name__ == "__main__":
    # Deterministic parameters (same shapes as the PyTorch module's __init__).
    A_np = np.array([[0.0, 1.0],
                     [-1.0, -0.5]], dtype=np.float32)   # (2, 2)
    B_np = np.array([[0.0],
                     [1.0]], dtype=np.float32)          # (2, 1)

    key = jax.random.PRNGKey(0)
    kx, ku = jax.random.split(key)
    N = 16
    X = jax.random.normal(kx, (N, 2), dtype=jnp.float32)
    U = jax.random.normal(ku, (N, 1), dtype=jnp.float32)

    dx = state_space_model_lin(X, U, A_np, B_np)
    dx = jax.block_until_ready(dx)

    # Reference (pure JAX) check of the nn.Linear semantics.
    ref = X @ jnp.asarray(A_np).T + U @ jnp.asarray(B_np).T
    np.testing.assert_allclose(np.asarray(dx), np.asarray(ref),
                               rtol=1e-5, atol=1e-5)
    print("KERNEL_OK")
</pallas_src>

<mosaic_0001>
module attributes {stable_mosaic.version = 11 : i64} {
  func.func @ss_lin_kernel(%arg0: i32, %arg1: memref<6xf32, #tpu.memory_space<smem>>, %arg2: memref<8x128xf32, #tpu.memory_space<vmem>>, %arg3: memref<8x128xf32, #tpu.memory_space<vmem>>, %arg4: memref<8x128xf32, #tpu.memory_space<vmem>>, %arg5: memref<8x128xf32, #tpu.memory_space<vmem>>, %arg6: memref<8x128xf32, #tpu.memory_space<vmem>>) attributes {dimension_semantics = [#tpu.dimension_semantics<parallel>], iteration_bounds = array<i64: 1>, scalar_prefetch = 1 : i64, scratch_operands = 0 : i64, tpu.core_type = #tpu.core_type<tc>, window_params = [{transform_indices = @transform_0, window_bounds = array<i64: 8, 128>}, {transform_indices = @transform_1, window_bounds = array<i64: 8, 128>}, {transform_indices = @transform_2, window_bounds = array<i64: 8, 128>}, {transform_indices = @transform_3, window_bounds = array<i64: 8, 128>}, {transform_indices = @transform_4, window_bounds = array<i64: 8, 128>}]} {
    %c0 = arith.constant 0 : index
    %0 = memref.load %arg1[%c0] : memref<6xf32, #tpu.memory_space<smem>>
    %c1 = arith.constant 1 : index
    %1 = memref.load %arg1[%c1] : memref<6xf32, #tpu.memory_space<smem>>
    %c2 = arith.constant 2 : index
    %2 = memref.load %arg1[%c2] : memref<6xf32, #tpu.memory_space<smem>>
    %c3 = arith.constant 3 : index
    %3 = memref.load %arg1[%c3] : memref<6xf32, #tpu.memory_space<smem>>
    %c4 = arith.constant 4 : index
    %4 = memref.load %arg1[%c4] : memref<6xf32, #tpu.memory_space<smem>>
    %c5 = arith.constant 5 : index
    %5 = memref.load %arg1[%c5] : memref<6xf32, #tpu.memory_space<smem>>
    %c0_0 = arith.constant 0 : index
    %c0_1 = arith.constant 0 : index
    %6 = vector.load %arg2[%c0_0, %c0_1] : memref<8x128xf32, #tpu.memory_space<vmem>>, vector<8x128xf32>
    %c0_2 = arith.constant 0 : index
    %c0_3 = arith.constant 0 : index
    %7 = vector.load %arg3[%c0_2, %c0_3] : memref<8x128xf32, #tpu.memory_space<vmem>>, vector<8x128xf32>
    %c0_4 = arith.constant 0 : index
    %c0_5 = arith.constant 0 : index
    %8 = vector.load %arg4[%c0_4, %c0_5] : memref<8x128xf32, #tpu.memory_space<vmem>>, vector<8x128xf32>
    %9 = vector.broadcast %0 : f32 to vector<8x128xf32>
    %10 = arith.mulf %9, %6 : vector<8x128xf32>
    %11 = vector.broadcast %1 : f32 to vector<8x128xf32>
    %12 = arith.mulf %11, %7 : vector<8x128xf32>
    %13 = arith.addf %10, %12 : vector<8x128xf32>
    %14 = vector.broadcast %4 : f32 to vector<8x128xf32>
    %15 = arith.mulf %14, %8 : vector<8x128xf32>
    %16 = arith.addf %13, %15 : vector<8x128xf32>
    %c0_6 = arith.constant 0 : index
    %c0_7 = arith.constant 0 : index
    %17 = vector.load %arg5[%c0_6, %c0_7] : memref<8x128xf32, #tpu.memory_space<vmem>>, vector<8x128xf32>
    tpu.vector_store %arg5[%c0_6, %c0_7], %16 {strides = array<i32>} : memref<8x128xf32, #tpu.memory_space<vmem>>, vector<8x128xf32>,
    %18 = vector.broadcast %2 : f32 to vector<8x128xf32>
    %19 = arith.mulf %18, %6 : vector<8x128xf32>
    %20 = vector.broadcast %3 : f32 to vector<8x128xf32>
    %21 = arith.mulf %20, %7 : vector<8x128xf32>
    %22 = arith.addf %19, %21 : vector<8x128xf32>
    %23 = vector.broadcast %5 : f32 to vector<8x128xf32>
    %24 = arith.mulf %23, %8 : vector<8x128xf32>
    %25 = arith.addf %22, %24 : vector<8x128xf32>
    %c0_8 = arith.constant 0 : index
    %c0_9 = arith.constant 0 : index
    %26 = vector.load %arg6[%c0_8, %c0_9] : memref<8x128xf32, #tpu.memory_space<vmem>>, vector<8x128xf32>
    tpu.vector_store %arg6[%c0_8, %c0_9], %25 {strides = array<i32>} : memref<8x128xf32, #tpu.memory_space<vmem>>, vector<8x128xf32>,
    return
  }
  func.func @transform_0(%arg0: i32, %arg1: memref<6xf32, #tpu.memory_space<smem>>) -> (i32, i32) {
    %c0_i32 = arith.constant 0 : i32
    %c0_i32_0 = arith.constant 0 : i32
    return %arg0, %c0_i32 : i32, i32
  }
  func.func @transform_1(%arg0: i32, %arg1: memref<6xf32, #tpu.memory_space<smem>>) -> (i32, i32) {
    %c0_i32 = arith.constant 0 : i32
    %c0_i32_0 = arith.constant 0 : i32
    return %arg0, %c0_i32 : i32, i32
  }
  func.func @transform_2(%arg0: i32, %arg1: memref<6xf32, #tpu.memory_space<smem>>) -> (i32, i32) {
    %c0_i32 = arith.constant 0 : i32
    %c0_i32_0 = arith.constant 0 : i32
    return %arg0, %c0_i32 : i32, i32
  }
  func.func @transform_3(%arg0: i32, %arg1: memref<6xf32, #tpu.memory_space<smem>>) -> (i32, i32) {
    %c0_i32 = arith.constant 0 : i32
    %c0_i32_0 = arith.constant 0 : i32
    return %arg0, %c0_i32 : i32, i32
  }
  func.func @transform_4(%arg0: i32, %arg1: memref<6xf32, #tpu.memory_space<smem>>) -> (i32, i32) {
    %c0_i32 = arith.constant 0 : i32
    %c0_i32_0 = arith.constant 0 : i32
    return %arg0, %c0_i32 : i32, i32
  }
}

</mosaic_0001>

<bundles_post_ra>
// kernel: tpu_custom_call.1
= control target key start
LH: loop header
LB: loop body
LE: loop exit
PB: predicated region body
PF: predicated region fallthrough
CT: control target
= control target key end

     0   :  { %s320_s0 = inlined_call_operand.hbm [shape: f32[6], index: 0, kind: input, shape index: {}]   ;;  %s321_s1 = inlined_call_operand.hbm [shape: f32[8,128], index: 1, kind: input, shape index: {}]   ;;  %s322_s2 = inlined_call_operand.hbm [shape: f32[8,128], index: 2, kind: input, shape index: {}]   ;;  %s323_s3 = inlined_call_operand.vmem [shape: f32[8,128], index: 3, kind: input, shape index: {}]   ;;  %s324_s4 = inlined_call_operand.hbm [shape: f32[8,128], index: 4, kind: output, shape index: {0}]   ;;  %s325_s5 = inlined_call_operand.hbm [shape: f32[8,128], index: 5, kind: output, shape index: {1}]  }
   0x1   :  { %s114_s20 = scalar_lea.hbm %s320_s0, 16 }
   0x2   :  { %p115_p0 = scmp.ne.s32.totalorder %s320_s0, %s114_s20  ;;  %p118_p1 = scmp.lt.u32.totalorder %s114_s20, %s320_s0 }
   0x4   :  { %p120_p2 = pnand %p118_p1, %p115_p0 }
   0x6   :  { %123 = shalt.err (!%p120_p2)  }
   0x7   :  { %s222_s25 = smov [#allocation3]  }
   0x8   :  { %12 = dma.hbm_to_smem %s320_s0, 16, %s222_s25, [#allocation2] }
   0x9   :  { %212 = dma.done.wait [#allocation2], 16 }
   0xa   :  { %213 = vsyncadd [#allocation2], 4294967280 }
   0xb   :  { %14 = sfence }
   0xc   :  { %15 = vsyncpa [#allocation5], 0 }
   0xd   :  { %16 = vsyncpa [#allocation8], 0 }
   0xe   :  { %17 = vsyncpa [#allocation6], 0 }
   0xf   :  { %18 = vsyncpa [#allocation11], 0  ;;  %s223_s28 = smov [#allocation4]   ;;  %s224_s30 = smov [#allocation7]  }
  0x10   :  { %s25_s29 = sshll.u32 %s223_s28, 4  ;;  %s35_s6 = sshll.u32 %s224_s30, 4  ;;  %s26_s29 = int_to_ptr.vmem [resolvable:$true] %s25_s29  ;;  %s36_s6 = int_to_ptr.vmem [resolvable:$true] %s35_s6 }
  0x11   :  { %s124_s9 = scalar_lea.hbm %s321_s1, 128 }
  0x12   :  { %p125_p3 = scmp.ne.s32.totalorder %s321_s1, %s124_s9  ;;  %p128_p4 = scmp.lt.u32.totalorder %s124_s9, %s321_s1 }
  0x14   :  { %p130_p5 = pnand %p128_p4, %p125_p3 }
  0x16   :  { %133 = shalt.err (!%p130_p5)
}
  0x17   :  { %s134_s13 = scalar_lea.vmem %s26_s29, 128  ;;  %p139_p7 = scmp.lt.s32.totalorder %s26_s29, %s26_s29 }
  0x18   :  { %p135_p6 = scmp.ne.s32.totalorder %s26_s29, %s134_s13  ;;  %p140_p8 = scmp.lt.s32.totalorder %s134_s13, %s134_s13 }
  0x1a   :  { %p141_p9 = por %p140_p8, %p139_p7 }
  0x1c   :  { %p142_p10 = pnand %p141_p9, %p135_p6 }
  0x1e   :  { %145 = shalt.err (!%p142_p10)
}
  0x1f   :  { %28 = dma.hbm_to_vmem [thread:$0]  %s321_s1, 128, %s26_s29, [#allocation5]  }
  0x20   :  { %s146_s18 = scalar_lea.hbm %s322_s2, 128 }
  0x21   :  { %p147_p11 = scmp.ne.s32.totalorder %s322_s2, %s146_s18  ;;  %p150_p12 = scmp.lt.u32.totalorder %s146_s18, %s322_s2 }
  0x23   :  { %p152_p13 = pnand %p150_p12, %p147_p11 }
  0x25   :  { %155 = shalt.err (!%p152_p13)
}
  0x26   :  { %s156_s23 = scalar_lea.vmem %s36_s6, 128  ;;  %p161_p1 = scmp.lt.s32.totalorder %s36_s6, %s36_s6 }
  0x27   :  { %p157_p0 = scmp.ne.s32.totalorder %s36_s6, %s156_s23  ;;  %p162_p2 = scmp.lt.s32.totalorder %s156_s23, %s156_s23 }
  0x29   :  { %p163_p3 = por %p162_p2, %p161_p1 }
  0x2b   :  { %p164_p4 = pnand %p163_p3, %p157_p0 }
  0x2d   :  { %167 = shalt.err (!%p164_p4)
}
  0x2e   :  { %38 = dma.hbm_to_vmem [thread:$0]  %s322_s2, 128, %s36_s6, [#allocation8]  }
  0x2f   :  { %214 = dma.done.wait [#allocation5], 128  }
  0x30   :  { %215 = vsyncadd [#allocation5], 4294967168 }
  0x31   :  { %216 = dma.done.wait [#allocation8], 128  }
  0x32   :  { %217 = vsyncadd [#allocation8], 4294967168  ;;  %s47_s25 = sld [smem:[#allocation3]]  ;;  %s104_s26 = sld [smem:[#allocation3 + $0x1]]  ;;  %v53_v0 = vld [vmem:[#allocation4] sm:$0xff]  ;;  %v54_v1 = vld [vmem:[#allocation7] sm:$0xff] }
  0x33   :  { %s107_s27 = sld [smem:[#allocation3 + $0x4]]  ;;  %s105_s28 = sld [smem:[#allocation3 + $0x2]]  ;;  %v55_v2 = vld [vmem:[%s323_s3] sm:$0xff] }
  0x34   :  { %s106_s29 = sld [smem:[#allocation3 + $0x3]]  ;;  %s108_s30 = sld [smem:[#allocation3 + $0x5]] }
  0x35   :  { %s225_s2 = smov [#allocation9]   ;;  %s226_s9 = smov [#allocation10]  }
  0x36   :  { %s80_s6 = sshll.u32 %s225_s2, 4  ;;  %s90_s10 = sshll.u32 %s226_s9, 4  ;;  %s81_s6 = int_to_ptr.vmem [resolvable:$true] %s80_s6  ;;  %s91_s10 = int_to_ptr.vmem [resolvable:$true] %s90_s10 }
  0x37   :  { %s168_s3 = scalar_lea.vmem %s81_s6, 128  ;;  %p173_p6 = scmp.lt.s32.totalorder %s81_s6, %s81_s6 }
  0x38   :  { %v56_v3 = vstv %s47_s25  ;;  %v58_v4 = vstv %s104_s26  ;;  %p169_p5 = scmp.ne.s32.totalorder %s81_s6, %s168_s3  ;;  %p174_p7 = scmp.lt.s32.totalorder %s168_s3, %s168_s3 }
  0x39   :  { %v57_v5 = vmul.f32 %v56_v3, %v53_v0  ;;  %v59_v6 = vmul.f32 %v58_v4, %v54_v1  ;;  %v61_v7 = vstv %s107_s27  ;;  %v65_v8 = vstv %s105_s28 }
  0x3a   :  { %v62_v9 = vmul.f32 %v61_v7, %v55_v2  ;;  %v66_v10 = vmul.f32 %v65_v8, %v53_v0  ;;  %v67_v11 = vstv %s106_s29  ;;  %v70_v12 = vstv %s108_s30  ;;  %p175_p8 = por %p174_p7, %p173_p6 }
  0x3b   :  { %v60_v13 = vadd.f32 %v59_v6, %v57_v5  ;;  %v68_v14 = vmul.f32 %v67_v11, %v54_v1  ;;  %v71_v15 = vmul.f32 %v70_v12, %v55_v2 }
  0x3c   :  { %p176_p9 = pnand %p175_p8, %p169_p5 }
  0x3d   :  { %v63_v16 = vadd.f32 %v62_v9, %v60_v13  ;;  %v69_v17 = vadd.f32 %v68_v14, %v66_v10 }
  0x3f   :  { %64 = vst [vmem:[#allocation9] sm:$0xff] %v63_v16  ;;  %v72_v18 = vadd.f32 %v71_v15, %v69_v17 }
  0x40   :  { %179 = shalt.err (!%p176_p9)
}
  0x41   :  { %s180_s12 = scalar_lea.hbm %s324_s4, 128 }
  0x42   :  { %p181_p10 = scmp.ne.s32.totalorder %s324_s4, %s180_s12  ;;  %p184_p11 = scmp.lt.u32.totalorder %s180_s12, %s324_s4 }
  0x44   :  { %p186_p12 = pnand %p184_p11, %p181_p10 }
  0x46   :  { %189 = shalt.err (!%p186_p12)
}
  0x47   :  { %83 = dma.vmem_to_hbm [thread:$0]  %s81_s6, 128, %s324_s4, [#allocation6]   ;;  %73 = vst [vmem:[#allocation10] sm:$0xff] %v72_v18 }
  0x48   :  { %s190_s19 = scalar_lea.vmem %s91_s10, 128  ;;  %p195_p0 = scmp.lt.s32.totalorder %s91_s10, %s91_s10 }
  0x49   :  { %p191_p13 = scmp.ne.s32.totalorder %s91_s10, %s190_s19  ;;  %p196_p1 = scmp.lt.s32.totalorder %s190_s19, %s190_s19 }
  0x4b   :  { %p197_p2 = por %p196_p1, %p195_p0 }
  0x4d   :  { %p198_p3 = pnand %p197_p2, %p191_p13 }
  0x4f   :  { %201 = shalt.err (!%p198_p3)
}
  0x50   :  { %s202_s22 = scalar_lea.hbm %s325_s5, 128 }
  0x51   :  { %p203_p4 = scmp.ne.s32.totalorder %s325_s5, %s202_s22  ;;  %p206_p5 = scmp.lt.u32.totalorder %s202_s22, %s325_s5 }
  0x53   :  { %p208_p6 = pnand %p206_p5, %p203_p4 }
  0x55   :  { %211 = shalt.err (!%p208_p6)
}
  0x56   :  { %93 = dma.vmem_to_hbm [thread:$0]  %s91_s10, 128, %s325_s5, [#allocation11]  }
  0x57   :  { %218 = dma.done.wait [#allocation6], 128  }
  0x58   :  { %219 = vsyncadd [#allocation6], 4294967168 }
  0x59   :  { %220 = dma.done.wait [#allocation11], 128  }
  0x5a   :  { %221 = vsyncadd [#allocation11], 4294967168 }
  0x5b   :  { %100 = vsyncpa [#allocation5], 1 }
  0x5c   :  { %101 = vsyncpa [#allocation8], 1 }
  0x5d   :  { %102 = vsyncpa [#allocation6], 1 }
  0x5e   :  { %103 = vsyncpa [#allocation11], 1 }

</bundles_post_ra>
